<compile_context>
chip_gen: v6e
topology: v6e:2x2x1
jax: 0.10.0
libtpu: 0.0.40
codegen_flags: <defaults>
</compile_context>

<pallas_src>
import functools
import math

import jax
import jax.numpy as jnp
from jax.experimental import pallas as pl
from jax.experimental.pallas import tpu as pltpu


# x-tile + out-tile, double-buffered (4 copies of one tile) must fit this budget.
_TILE_BUDGET_BYTES = 12 * 1024 * 1024
# Cap lane width so the broadcast modulation vectors stay vreg-resident (v5e friendly).
_LANE_CAP = 2048


def _round_up(a, m):
    return ((a + m - 1) // m) * m


# ----------------------------- kernels -------------------------------------


def _mod_channel_last_kernel(vec_ref, x_ref, o_ref, *, use_gate):
    # x_ref / o_ref: (1, T, TL);  vec_ref: (1, n_vec, 1, TL)
    v = vec_ref[0]                        # (n_vec, 1, TL)
    y = x_ref[0] * v[1] + v[0]            # (1, TL) broadcasts over the T rows
    if use_gate:
        y = y * v[2]
    o_ref[0] = y


def _mod_channel_first_kernel(vec_ref, x_ref, o_ref, *, use_gate):
    # x_ref / o_ref: (1, Tc, TL);  vec_ref: (1, n_vec, Tc, 1)
    v = vec_ref[0]                        # (n_vec, Tc, 1)
    y = x_ref[0] * v[1] + v[0]            # (Tc, 1) broadcasts along the lane axis
    if use_gate:
        y = y * v[2]
    o_ref[0] = y


# ----------------------------- wrapper helpers ------------------------------


def _adaln_vectors(c, w, b, C, gate):
    # adaLN modulation: SiLU(c) @ W + b.  Tiny M=B matmul -> leave to XLA; feeding it
    # into the kernel would waste the MXU and force W residency inside the kernel.
    mod = jnp.dot(jax.nn.silu(c.astype(jnp.float32)), w.astype(jnp.float32),
                  preferred_element_type=jnp.float32) + b.astype(jnp.float32)
    shift = mod[:, 0:C]
    scale1 = 1.0 + mod[:, C:2 * C]
    g = mod[:, 2 * C:3 * C] if gate else None
    return shift, scale1, g


def _forward_channel_last(x, shift, scale1, g, use_gate):
    """x is channel-last (B, ..., C); kernel runs on (B, HW2, KC)."""
    orig_shape = x.shape
    B = x.shape[0]
    C = x.shape[-1]
    HW = math.prod(x.shape[1:-1]) if x.ndim > 2 else 1
    dtype = x.dtype
    itemsize = jnp.dtype(dtype).itemsize

    # Fold k spatial rows into the lane dim so the kernel's last dim % 128 == 0
    # (lane-dense vst).  Pad HW up to a multiple of k (one cheap pad copy is far
    # cheaper than lane-sparse masked stores).
    k = 1 if C % 128 == 0 else 128 // math.gcd(C, 128)
    HW_pad = _round_up(max(HW, 1), k)
    x2 = x.reshape(B, HW, C)
    if HW_pad != HW:
        x2 = jnp.pad(x2, ((0, 0), (0, HW_pad - HW), (0, 0)))
    HW2 = HW_pad // k
    KC = k * C
    x2 = x2.reshape(B, HW2, KC)

    vec_list = [shift, scale1] + ([g] if use_gate else [])
    n_vec = len(vec_list)
    # Pack all modulation vectors into ONE per-batch array (single input pipeline),
    # tiled k times along the folded lane dim.
    vec = jnp.stack([jnp.tile(v, (1, k)) for v in vec_list], axis=1)
    vec = vec.reshape(B, n_vec, 1, KC).astype(dtype)

    # Lane tile: full KC unless very wide (keep broadcast vectors vreg-resident).
    TL = KC if KC <= _LANE_CAP else _LANE_CAP
    # Row tile: multiple of 8 sized against the VMEM budget (cdiv grid -> no
    # divisibility cliffs; full-extent only when it actually fits the budget).
    max_rows = max(8, (_TILE_BUDGET_BYTES // (4 * TL * itemsize)) // 8 * 8)
    T = HW2 if (HW2 <= 8 or max_rows >= HW2) else max_rows

    n_row_tiles = pl.cdiv(HW2, T)
    n_lane_tiles = pl.cdiv(KC, TL)
    # Megacore / v7x 2-TC: expose at least 2 parallel tiles.
    if B * n_row_tiles * n_lane_tiles < 2:
        if HW2 >= 16:
            T = _round_up(pl.cdiv(HW2, 2), 8)
            n_row_tiles = pl.cdiv(HW2, T)
        elif KC >= 256:
            TL = max(128, _round_up(pl.cdiv(KC, 2), 128))
            n_lane_tiles = pl.cdiv(KC, TL)

    x_spec = pl.BlockSpec((1, T, TL), lambda bi, ri, li: (bi, ri, li))
    vec_spec = pl.BlockSpec((1, n_vec, 1, TL), lambda bi, ri, li: (bi, 0, 0, li))

    tile_bytes = T * TL * itemsize
    vec_block_bytes = n_vec * TL * itemsize
    vmem_limit = int(4 * tile_bytes + 2 * vec_block_bytes) + (4 << 20)

    flops = (3 if use_gate else 2) * B * HW2 * KC
    bytes_accessed = 2 * B * HW2 * KC * itemsize + B * n_vec * KC * itemsize

    out = pl.pallas_call(
        functools.partial(_mod_channel_last_kernel, use_gate=use_gate),
        out_shape=jax.ShapeDtypeStruct((B, HW2, KC), dtype),
        grid=(B, n_row_tiles, n_lane_tiles),
        in_specs=[vec_spec, x_spec],
        out_specs=x_spec,
        compiler_params=pltpu.CompilerParams(
            dimension_semantics=("parallel", "parallel", "parallel"),
            vmem_limit_bytes=vmem_limit),
        cost_estimate=pl.CostEstimate(flops=flops, transcendentals=0,
                                      bytes_accessed=bytes_accessed),
    )(vec, x2)

    out = out.reshape(B, HW_pad, C)
    if HW_pad != HW:
        out = out[:, :HW, :]
    return out.reshape(orig_shape)


def _forward_channel_first(x, shift, scale1, g, use_gate):
    """x is (B, C, H, W) / (B, C, L); kernel runs natively on (B, C, HW) — no transposes."""
    orig_shape = x.shape
    B, C = x.shape[0], x.shape[1]
    HW = math.prod(x.shape[2:]) if x.ndim > 2 else 1
    dtype = x.dtype
    itemsize = jnp.dtype(dtype).itemsize

    x2 = x.reshape(B, C, HW)

    vec_list = [shift, scale1] + ([g] if use_gate else [])
    n_vec = len(vec_list)
    # (B, n_vec, C, 1): C on sublanes, broadcast along the lane (HW) axis in-kernel.
    vec = jnp.stack(vec_list, axis=1).reshape(B, n_vec, C, 1).astype(dtype)

    # Channel (sublane) tile: full C unless an 128-lane column of full C already
    # blows the budget (then a multiple-of-8 tile with a cdiv grid).
    if 4 * C * 128 * itemsize <= _TILE_BUDGET_BYTES:
        Tc = C
    else:
        Tc = max(8, (_TILE_BUDGET_BYTES // (4 * 128 * itemsize)) // 8 * 8)

    # Lane (HW) tile: full HW if it fits, else the largest multiple of 128 in budget.
    max_lanes = max(128, (_TILE_BUDGET_BYTES // (4 * Tc * itemsize)) // 128 * 128)
    TL = HW if (HW <= 128 or max_lanes >= HW) else max_lanes

    n_c_tiles = pl.cdiv(C, Tc)
    n_l_tiles = pl.cdiv(HW, TL)
    # Megacore / v7x 2-TC: expose at least 2 parallel tiles.
    if B * n_c_tiles * n_l_tiles < 2:
        if HW >= 256:
            TL = max(128, _round_up(pl.cdiv(HW, 2), 128))
            n_l_tiles = pl.cdiv(HW, TL)
        elif C >= 16:
            Tc = _round_up(pl.cdiv(C, 2), 8)
            n_c_tiles = pl.cdiv(C, Tc)

    x_spec = pl.BlockSpec((1, Tc, TL), lambda bi, ci, li: (bi, ci, li))
    vec_spec = pl.BlockSpec((1, n_vec, Tc, 1), lambda bi, ci, li: (bi, 0, ci, 0))

    tile_bytes = Tc * TL * itemsize
    vec_block_bytes = n_vec * Tc * itemsize
    vmem_limit = int(4 * tile_bytes + 2 * vec_block_bytes) + (4 << 20)

    flops = (3 if use_gate else 2) * B * C * HW
    bytes_accessed = 2 * B * C * HW * itemsize + B * n_vec * C * itemsize

    out = pl.pallas_call(
        functools.partial(_mod_channel_first_kernel, use_gate=use_gate),
        out_shape=jax.ShapeDtypeStruct((B, C, HW), dtype),
        grid=(B, n_c_tiles, n_l_tiles),
        in_specs=[vec_spec, x_spec],
        out_specs=x_spec,
        compiler_params=pltpu.CompilerParams(
            dimension_semantics=("parallel", "parallel", "parallel"),
            vmem_limit_bytes=vmem_limit),
        cost_estimate=pl.CostEstimate(flops=flops, transcendentals=0,
                                      bytes_accessed=bytes_accessed),
    )(vec, x2)

    return out.reshape(orig_shape)


# ------------------------------ public wrapper -------------------------------


def modulator_forward(x, c, w, b, *, gate=False, channel_last=True, apply_gate=True):
    """Pallas TPU forward of Modulator.

    x: channel-last (B, ..., C) if channel_last=True, else (B, C, H, W).
    c: (B, in_dims); w: (in_dims, chunks*C); b: (chunks*C,)."""
    B = x.shape[0]
    C = x.shape[-1] if channel_last else x.shape[1]
    shift, scale1, g = _adaln_vectors(c, w, b, C, gate)

    use_gate = gate and apply_gate
    g_in = g if use_gate else None
    if channel_last:
        out = _forward_channel_last(x, shift, scale1, g_in, use_gate)
    else:
        out = _forward_channel_first(x, shift, scale1, g_in, use_gate)

    if gate and not apply_gate:
        # PyTorch returns (x_modulated, gate_unsqueezed) on this path.
        if channel_last:
            g_u = g.reshape((B,) + (1,) * (x.ndim - 2) + (C,)).astype(x.dtype)
        else:
            g_u = g.reshape((B, C) + (1,) * (x.ndim - 2)).astype(x.dtype)
        return out, g_u
    return out


# ------------------------------- tests ---------------------------------------


if __name__ == "__main__":
    key = jax.random.PRNGKey(0)

    # --- Test 1: NCHW (channel_last=False), gate=True, apply_gate=True ---
    B, Cch, H, W = 2, 4, 16, 16
    in_dims = 32
    chunks = 3
    k1, k2, k3, k4 = jax.random.split(key, 4)
    x = jax.random.normal(k1, (B, Cch, H, W), dtype=jnp.float32)
    c = jax.random.normal(k2, (B, in_dims), dtype=jnp.float32)
    # NOTE: PyTorch zero-inits the adaLN linear (identity modulation); use small
    # random weights instead so the modulation path is actually exercised.
    w = 0.05 * jax.random.normal(k3, (in_dims, chunks * Cch), dtype=jnp.float32)
    bias = 0.05 * jax.random.normal(k4, (chunks * Cch,), dtype=jnp.float32)

    out = modulator_forward(x, c, w, bias, gate=True, channel_last=False,
                            apply_gate=True)
    out = jax.block_until_ready(out)

    silu = c * jax.nn.sigmoid(c)
    mod = silu @ w + bias
    shift_r, scale_r, gate_r = jnp.split(mod, chunks, axis=1)
    xc = jnp.transpose(x, (0, 2, 3, 1))
    ref_mod = xc * (1.0 + scale_r[:, None, None, :]) + shift_r[:, None, None, :]
    ref1 = jnp.transpose(ref_mod * gate_r[:, None, None, :], (0, 3, 1, 2))
    assert out.shape == (B, Cch, H, W) and out.dtype == jnp.float32
    assert jnp.allclose(out, ref1, atol=1e-5, rtol=1e-5), "mismatch (gated NCHW)"

    # --- Test 2: gate=True, apply_gate=False -> (x, gate) tuple, NCHW ---
    out2, g2 = modulator_forward(x, c, w, bias, gate=True, channel_last=False,
                                 apply_gate=False)
    out2, g2 = jax.block_until_ready((out2, g2))
    ref2_x = jnp.transpose(ref_mod, (0, 3, 1, 2))
    ref2_g = jnp.transpose(gate_r[:, None, None, :], (0, 3, 1, 2))
    assert jnp.allclose(out2, ref2_x, atol=1e-5, rtol=1e-5), "mismatch (no-gate x)"
    assert jnp.allclose(g2, ref2_g, atol=1e-5, rtol=1e-5), "mismatch (gate tensor)"

    # --- Test 3: channel-last (B, L, C) with C % 128 == 0, gate=False ---
    B3, L3, C3 = 2, 8, 256
    k5, k6, k7, k8 = jax.random.split(jax.random.PRNGKey(1), 4)
    x3 = jax.random.normal(k5, (B3, L3, C3), dtype=jnp.float32)
    c3 = jax.random.normal(k6, (B3, in_dims), dtype=jnp.float32)
    w3 = 0.05 * jax.random.normal(k7, (in_dims, 2 * C3), dtype=jnp.float32)
    b3 = 0.05 * jax.random.normal(k8, (2 * C3,), dtype=jnp.float32)
    out3 = jax.block_until_ready(
        modulator_forward(x3, c3, w3, b3, gate=False, channel_last=True))
    mod3 = (c3 * jax.nn.sigmoid(c3)) @ w3 + b3
    sh3, sc3 = jnp.split(mod3, 2, axis=1)
    ref3 = x3 * (1.0 + sc3[:, None, :]) + sh3[:, None, :]
    assert jnp.allclose(out3, ref3, atol=1e-5, rtol=1e-5), "mismatch (BLC path)"

    # --- Test 4: channel-last (B, H, W, C) with C=4 (lane fold + HW padding) ---
    B4, H4, W4, C4 = 2, 10, 10, 4   # HW=100 not a multiple of k=32 -> exercises pad
    k9, k10, k11, k12 = jax.random.split(jax.random.PRNGKey(2), 4)
    x4 = jax.random.normal(k9, (B4, H4, W4, C4), dtype=jnp.float32)
    c4 = jax.random.normal(k10, (B4, in_dims), dtype=jnp.float32)
    w4 = 0.05 * jax.random.normal(k11, (in_dims, 2 * C4), dtype=jnp.float32)
    b4 = 0.05 * jax.random.normal(k12, (2 * C4,), dtype=jnp.float32)
    out4 = jax.block_until_ready(
        modulator_forward(x4, c4, w4, b4, gate=False, channel_last=True))
    mod4 = (c4 * jax.nn.sigmoid(c4)) @ w4 + b4
    sh4, sc4 = jnp.split(mod4, 2, axis=1)
    ref4 = x4 * (1.0 + sc4[:, None, None, :]) + sh4[:, None, None, :]
    assert out4.shape == (B4, H4, W4, C4)
    assert jnp.allclose(out4, ref4, atol=1e-5, rtol=1e-5), "mismatch (folded BHWC)"

    print("KERNEL_OK")
</pallas_src>

<mosaic_0001>
module attributes {stable_mosaic.version = 11 : i64} {
  func.func @_mod_channel_first_kernel(%arg0: i32, %arg1: i32, %arg2: i32, %arg3: memref<1x3x4x1xf32, #tpu.memory_space<vmem>>, %arg4: memref<1x4x256xf32, #tpu.memory_space<vmem>>, %arg5: memref<1x4x256xf32, #tpu.memory_space<vmem>>) attributes {dimension_semantics = [#tpu.dimension_semantics<parallel>, #tpu.dimension_semantics<parallel>, #tpu.dimension_semantics<parallel>], iteration_bounds = array<i64: 2, 1, 1>, scalar_prefetch = 0 : i64, scratch_operands = 0 : i64, tpu.core_type = #tpu.core_type<tc>, window_params = [{transform_indices = @transform_0, window_bounds = array<i64: 1, 3, 4, 1>}, {transform_indices = @transform_1, window_bounds = array<i64: 1, 4, 256>}, {transform_indices = @transform_2, window_bounds = array<i64: 1, 4, 256>}]} {
    %c0 = arith.constant 0 : index
    %c0_0 = arith.constant 0 : index
    %c0_1 = arith.constant 0 : index
    %c0_2 = arith.constant 0 : index
    %0 = vector.load %arg3[%c0, %c0_0, %c0_1, %c0_2] : memref<1x3x4x1xf32, #tpu.memory_space<vmem>>, vector<1x3x4x1xf32>
    %1 = vector.shape_cast %0 : vector<1x3x4x1xf32> to vector<3x4x1xf32>
    %c0_3 = arith.constant 0 : index
    %c0_4 = arith.constant 0 : index
    %c0_5 = arith.constant 0 : index
    %2 = vector.load %arg4[%c0_3, %c0_4, %c0_5] : memref<1x4x256xf32, #tpu.memory_space<vmem>>, vector<1x4x256xf32>
    %3 = vector.shape_cast %2 : vector<1x4x256xf32> to vector<4x256xf32>
    %4 = vector.extract_strided_slice %1 {offsets = [1, 0, 0], sizes = [1, 4, 1], strides = [1, 1, 1]} : vector<3x4x1xf32> to vector<1x4x1xf32>
    %5 = vector.shape_cast %4 : vector<1x4x1xf32> to vector<4x1xf32>
    %6 = vector.broadcast %5 : vector<4x1xf32> to vector<4x256xf32>
    %7 = arith.mulf %3, %6 : vector<4x256xf32>
    %8 = vector.extract_strided_slice %1 {offsets = [0, 0, 0], sizes = [1, 4, 1], strides = [1, 1, 1]} : vector<3x4x1xf32> to vector<1x4x1xf32>
    %9 = vector.shape_cast %8 : vector<1x4x1xf32> to vector<4x1xf32>
    %10 = vector.broadcast %9 : vector<4x1xf32> to vector<4x256xf32>
    %11 = arith.addf %7, %10 : vector<4x256xf32>
    %12 = vector.extract_strided_slice %1 {offsets = [2, 0, 0], sizes = [1, 4, 1], strides = [1, 1, 1]} : vector<3x4x1xf32> to vector<1x4x1xf32>
    %13 = vector.shape_cast %12 : vector<1x4x1xf32> to vector<4x1xf32>
    %14 = vector.broadcast %13 : vector<4x1xf32> to vector<4x256xf32>
    %15 = arith.mulf %11, %14 : vector<4x256xf32>
    %c0_6 = arith.constant 0 : index
    %c0_7 = arith.constant 0 : index
    %c0_8 = arith.constant 0 : index
    %16 = vector.load %arg5[%c0_6, %c0_7, %c0_8] : memref<1x4x256xf32, #tpu.memory_space<vmem>>, vector<1x4x256xf32>
    %17 = vector.shape_cast %16 : vector<1x4x256xf32> to vector<4x256xf32>
    %18 = vector.shape_cast %15 : vector<4x256xf32> to vector<1x4x256xf32>
    tpu.vector_store %arg5[%c0_6, %c0_7, %c0_8], %18 {strides = array<i32>} : memref<1x4x256xf32, #tpu.memory_space<vmem>>, vector<1x4x256xf32>,
    return
  }
  func.func @transform_0(%arg0: i32, %arg1: i32, %arg2: i32) -> (i32, i32, i32, i32) {
    %c0_i32 = arith.constant 0 : i32
    %c0_i32_0 = arith.constant 0 : i32
    %c0_i32_1 = arith.constant 0 : i32
    return %arg0, %c0_i32, %arg1, %c0_i32_0 : i32, i32, i32, i32
  }
  func.func @transform_1(%arg0: i32, %arg1: i32, %arg2: i32) -> (i32, i32, i32) {
    %c0_i32 = arith.constant 0 : i32
    return %arg0, %arg1, %arg2 : i32, i32, i32
  }
  func.func @transform_2(%arg0: i32, %arg1: i32, %arg2: i32) -> (i32, i32, i32) {
    %c0_i32 = arith.constant 0 : i32
    return %arg0, %arg1, %arg2 : i32, i32, i32
  }
}

</mosaic_0001>

<bundles_post_ra>
// kernel: tpu_custom_call.1
= control target key start
LH: loop header
LB: loop body
LE: loop exit
PB: predicated region body
PF: predicated region fallthrough
CT: control target
= control target key end

     0   :  { %7 = vsyncpa [#allocation3], 0  ;;  %s669_s0 = inlined_call_operand.vmem [shape: f32[2,3,4,1], index: 0, kind: input, shape index: {}]   ;;  %s670_s1 = inlined_call_operand.vmem [shape: f32[2,4,256], index: 1, kind: input, shape index: {}]   ;;  %s671_s2 = inlined_call_operand.hbm [shape: f32[2,4,256], index: 2, kind: output, shape index: {}]  }
   0x1   :  { %9 = vsyncpa [#allocation3 + $0x1], 0  ;;  %s567_s9 = smov 0   ;;  %s569_s10 = smov 0  }
   0x2   :  { %s571_s11 = smov 0   ;;  %s573_s12 = smov 0  }
   0x3   :  { %s575_s13 = smov 0   ;;  %s577_s14 = smov 0  }
   0x4 LB: > { %s395_s15 = sadd.s32 4294967295, %s547_s14   ;;  %s396_s16 = sadd.s32 4294967294, %s547_s14   ;;  %s547_s14 = sphi %s577_s14, %s15_s14   ;;  %s543_s13 = sphi %s575_s13, %s678_s13   ;;  %s539_s12 = sphi %s573_s12, %s677_s12   ;;  %s535_s11 = sphi %s571_s11, %s676_s11   ;;  %s531_s10 = sphi %s569_s10, %s675_s10   ;;  %s527_s9 = sphi %s567_s9, %s674_s9  }
   0x5   : > { %s34_s17 = sadd.s32 1, %s543_s13  ;;  %s103_s18 = sadd.s32 1, %s535_s11 }
   0x6   : > { %p36_p0 = scmp.ge.s32.totalorder %s34_s17, 2  ;;  %p113_p1 = scmp.ne.s32.totalorder %s535_s11, %s531_s10 }
   0x7   : > { %p114_p2 = scmp.eq.s32.totalorder %s395_s15, 1  ;;  %p119_p3 = scmp.ne.s32.totalorder %s531_s10, %s527_s9 }
   0x8   : > { %s680_s17 = smov (%p36_p0, %s34_s17), 0  ;;  %p120_p5 = scmp.eq.s32.totalorder %s396_s16, 1 }
   0x9   : > { %p607_p4 = por %p114_p2, %p113_p1  ;;  %s96_s20 = ssub.s32 %s543_s13, %s680_s17 }
   0xa   : > { %p399_p6 = scmp.ge.s32.totalorder %s547_s14, 1  ;;  %p101_p7 = scmp.eq.s32.totalorder %s96_s20, 0 }
   0xb   : > { %p614_p8 = por %p120_p5, %p119_p3  ;;  %p166_p9 = scmp.lt.s32.totalorder %s547_s14, 3 }
   0xc   : > { %s620_s22 = scalar_select %p101_p7, %s535_s11, %s103_s18  }
   0xd   : > { %p167_p10 = pnand %p399_p6, %p166_p9 }
   0xe   : > { %p204_p11 = scmp.lt.s32.totalorder (!%p167_p10), %s539_s12, 1  ;;  %s201_s29 = sand.u32 (!%p167_p10), 1, %s531_s10  }
   0xf   : > { %170 = sbr.rel (%p167_p10) target bundleno = 173 (0xad), region = 28  ;;  %s400_s5 = sshll.u32 (!%p167_p10), %s201_s29, 3 }
  0x10   : > { %s410_s6 = sshll.u32 (!%p167_p10), %s539_s12, 7  ;;  %s203_s7 = scalar_lea.vmem (!%p167_p10), [#allocation2], %s400_s5 }
  0x11   : > { %s290_s8 = sshll.u32 (!%p167_p10), %s203_s7, 4  ;;  %s288_s18 = scalar_lea.hbm (!%p167_p10), %s671_s2, %s410_s6  ;;  %s291_s8 = int_to_ptr.vmem [resolvable:$true] %s290_s8 }
  0x12   : > { %s272_s20 = scalar_lea.sflag (!%p167_p10), [#allocation3], %s201_s29 }
  0x14   : > { %v549_v0 = vmov 0   ;;  %s205_s23 = scalar_select %p204_p11, %s539_s12, 1  ;;  %v550_v4 = vmov 839922192   ;;  %v238_v6 = vlaneseq }
  0x15   : > { %469 = vset.pattern.permute.xlu0 %v549_v0  ;;  %470 = vset.pattern.permute.xlu1 %v549_v0  ;;  %v236_v5 = vunpack.c.l.s4 %v550_v4 }
  0x16   : > { %s411_s24 = smul.u32 12, %s205_s23  ;;  %v239_v8 = vshrl.u32 %v238_v6, 7  ;;  %s409_s28 = sshll.u32 %s205_s23, 3 }
  0x17   : > { %v237_v7 = vunpack.c.0.s8 %v236_v5  ;;  %s224_s4 = scalar_lea.vmem %s670_s1, %s409_s28  ;;  %s471_s23 = scalar_lea.vmem %s291_s8, 128 }
  0x18   : > { %s211_s27 = scalar_lea.vmem %s669_s0, %s411_s24  ;;  %v230_v12 = vld [vmem:[%s224_s4] sm:$0xff]  ;;  %p472_p12 = scmp.ne.s32.totalorder %s291_s8, %s471_s23 }
  0x19   : > { %v228_v1 = vld [vmem:[%s211_s27 + $0x4] sm:$0xf]  ;;  %v229_v2 = vld [vmem:[%s211_s27 + $0x8] sm:$0xf]  ;;  %v227_v3 = vld [vmem:[%s211_s27] sm:$0xf]  ;;  %v240_v9 = vsub.s32 %v237_v7, %v239_v8 }
  0x1a   : > { %233 = vperm.xlu0 %469, %v228_v1   ;;  %259 = vperm.xlu1 %470, %v229_v2   ;;  %p473_p13 = pnand %p472_p12, %p607_p4  ;;  %s551_s24 = smov [#allocation2]  }
  0x1b   : > { %s475_s25 = sshll.u32 %s551_s24, 4  ;;  %s476_s25 = int_to_ptr.vmem [resolvable:$false] %s475_s25 }
  0x1c   : > { %p474_p0 = pneg %p473_p13  ;;  %s477_s12 = scalar_lea.vmem %s476_s25, 256 }
  0x1d   : > { %p478_p1 = scmp.lt.s32.totalorder %s291_s8, %s476_s25  ;;  %p479_p2 = scmp.lt.s32.totalorder %s477_s12, %s471_s23 }
  0x1e   : > { %246 = vperm.xlu0 %469, %v227_v3  }
  0x1f   : > { %p480_p3 = por %p479_p2, %p478_p1 }
  0x21   : > { %p481_p5 = pnand %p480_p3, %p474_p0 }
  0x95   : > { %v234_v10 = vpop.permute.xlu0 %233  ;;  %v260_v13 = vpop.permute.xlu1 %259 }
  0x96   : > { %v241_v11 = vrot.slane %v234_v10, %v240_v9  ;;  %v267_v17 = vrot.slane %v260_v13, %v240_v9 }
  0x98   : > { %v243_v15 = vmul.f32 %v241_v11, %v230_v12 }
  0x99   : > { %v247_v14 = vpop.permute.xlu0 %246 }
  0x9a   : > { %v254_v16 = vrot.slane %v247_v14, %v240_v9 }
  0x9c   : > { %v256_v18 = vadd.f32 %v254_v16, %v243_v15 }
  0x9e   : > { %v269_v19 = vmul.f32 %v267_v17, %v256_v18 }
  0xa0   : > { %270 = vst [vmem:[%s203_s7] sm:$0xff] %v269_v19 }
  0xa1   : > { %484 = shalt.err (!%p481_p5)
}
  0xa2   : > { %s485_s26 = scalar_lea.hbm %s288_s18, 128  ;;  %s489_s29 = scalar_lea.hbm %s671_s2, 256 }
  0xa3   : > { %p486_p6 = scmp.ne.s32.totalorder %s288_s18, %s485_s26  ;;  %p490_p10 = scmp.lt.s32.totalorder %s288_s18, %s671_s2 }
  0xa4   : > { %p491_p11 = scmp.lt.s32.totalorder %s489_s29, %s485_s26 }
  0xa5   : > { %p487_p7 = pnand %p486_p6, %p607_p4 }
  0xa6   : > { %p492_p12 = por %p491_p11, %p490_p10 }
  0xa7   : > { %p488_p9 = pneg %p487_p7 }
  0xa9   : > { %p493_p13 = pnand %p492_p12, %p488_p9 }
  0xab   : > { %496 = shalt.err (!%p493_p13)
}
  0xac   : > { %412 = dma.vmem_to_hbm [thread:$0]  (%p607_p4), %s291_s8, 128, %s288_s18, %s272_s20  }
  0xad PF: > { %p418_p0 = scmp.ge.s32.totalorder %s547_s14, 2  ;;  %s302_s4 = sand.u32 1, %s527_s9  }
  0xae   : > { %s303_s5 = scalar_lea.sflag [#allocation3], %s302_s4 }
  0xaf   : > { %p415_p1 = pnand %p418_p0, %p614_p8 }
  0xb1   : > { %p416_p2 = pneg %p415_p1 }
  0xb3   : > { %522 = dma.done.wait (%p416_p2), %s303_s5, 128  }
  0xb4   : > { %524 = vsyncadd (%p416_p2), %s303_s5, 4294967168  ;;  %s15_s14 = sadd.s32 1, %s547_s14   ;;  %s674_s9 = smov %s531_s10 }
  0xb5   : > { %p12_p3 = scmp.ge.s32.totalorder %s15_s14, 4   ;;  %s675_s10 = smov %s535_s11 }
  0xb6   : > { %s676_s11 = smov %s620_s22  ;;  %s677_s12 = smov %s543_s13 }
  0xb7   : > { %s678_s13 = smov %s680_s17  ;;  %14 = sbr.rel (!%p12_p3) target bundleno = 4 (0x4), region = 66 }
  0xbc   :  { %308 = vsyncpa [#allocation3], 1 }
  0xbd   :  { %310 = vsyncpa [#allocation3 + $0x1], 1 }

</bundles_post_ra>
